<compile_context>
chip_gen: v6e
topology: v6e:2x2x1
jax: 0.10.0
libtpu: 0.0.40
codegen_flags: <defaults>
</compile_context>

<pallas_src>
import functools

import jax
import jax.numpy as jnp
from jax.experimental import pallas as pl
from jax.experimental.pallas import tpu as pltpu


def _round_up(n: int, m: int) -> int:
    return ((n + m - 1) // m) * m


def _softplus(v):
    # Overflow-safe log(1 + exp(v)); uses only exp / log (Mosaic-safe, EUP-native).
    return jnp.maximum(v, 0.0) + jnp.log(1.0 + jnp.exp(-jnp.abs(v)))


def _cl_loss_kernel(logits_ref, target_ref, out_ref, *, reduction: str, batch: int):
    i = pl.program_id(0)

    x = logits_ref[...].astype(jnp.float32)        # (TB, K) — cast AFTER the DMA
    t = target_ref[...]                            # (TB, 1) int32, values in [0, K]
    TB, K = x.shape

    # --- Gather first: each row only needs x[t] and x[t-1]. ------------------
    col = jax.lax.broadcasted_iota(jnp.int32, (TB, K), 1)
    x_t = jnp.sum(jnp.where(col == t, x, 0.0), axis=1, keepdims=True)        # 0 if t == K
    x_tm1 = jnp.sum(jnp.where(col == t - 1, x, 0.0), axis=1, keepdims=True)  # 0 if t == 0

    # --- Scalar (per-row) math on (TB, 1) only. -------------------------------
    # PyTorch formula:
    #   first (t==0): log(1+e^{x0}) - x0                      = softplus(-x_t)
    #   mid         : softplus(x_t)+softplus(x_{t-1})-log(e^{x_t}-e^{x_{t-1}})
    #               = softplus(-x_t)+softplus(x_{t-1})-log(1-e^{x_{t-1}-x_t})
    #   last (t==K) : softplus(x_{K-1})                        = softplus(x_tm1)
    sp_neg_t = _softplus(-x_t)
    sp_tm1 = _softplus(x_tm1)
    mid = sp_neg_t + sp_tm1 - jnp.log(1.0 - jnp.exp(x_tm1 - x_t))
    loss = jnp.where(t == 0, sp_neg_t, jnp.where(t == K, sp_tm1, mid))        # (TB, 1)

    if reduction == "none":
        out_ref[...] = loss
    else:
        # Mask rows that are only batch padding (global row index >= batch).
        row = i * TB + jax.lax.broadcasted_iota(jnp.int32, (TB, 1), 0)
        part = jnp.sum(jnp.where(row < batch, loss, 0.0))

        @pl.when(i == 0)
        def _init():
            out_ref[...] = jnp.zeros_like(out_ref)

        out_ref[...] = out_ref[...] + part

        if reduction == "mean":
            @pl.when(i == pl.num_programs(0) - 1)
            def _finalize():
                out_ref[...] = out_ref[...] / float(batch)


def cl_with_logits_loss(logits: jax.Array, target: jax.Array,
                        reduction: str = "mean", block_rows: int | None = None):
    """logits: (B, L-1) float (any float dtype); target: (B,) int in [0, L-1]."""
    assert reduction in ("none", "mean", "sum")
    B, K = logits.shape

    if block_rows is None:
        block_rows = min(2048, _round_up(B, 8))     # big tiles -> near HBM roofline
    block_rows = _round_up(block_rows, 8)

    B_pad = _round_up(B, block_rows)
    num_tiles = B_pad // block_rows

    target2d = target.astype(jnp.int32).reshape(B, 1)
    if B_pad != B:
        logits = jnp.pad(logits, ((0, B_pad - B), (0, 0)))
        target2d = jnp.pad(target2d, ((0, B_pad - B), (0, 0)))

    kernel = functools.partial(_cl_loss_kernel, reduction=reduction, batch=B)

    if reduction == "none":
        out_shape = jax.ShapeDtypeStruct((B_pad, 1), jnp.float32)
        out_spec = pl.BlockSpec((block_rows, 1), lambda i: (i, 0))
        dims = ("parallel",)            # independent tiles (megacore-friendly)
    else:
        out_shape = jax.ShapeDtypeStruct((1, 1), jnp.float32)
        out_spec = pl.BlockSpec((1, 1), lambda i: (0, 0))   # resident accumulator
        dims = ("arbitrary",)           # reduction axis

    out = pl.pallas_call(
        kernel,
        out_shape=out_shape,
        grid=(num_tiles,),
        in_specs=[
            pl.BlockSpec((block_rows, K), lambda i: (i, 0)),   # logits tile
            pl.BlockSpec((block_rows, 1), lambda i: (i, 0)),   # target tile
        ],
        out_specs=out_spec,
        compiler_params=pltpu.CompilerParams(
            dimension_semantics=dims,
            vmem_limit_bytes=32 * 1024 * 1024,   # safe on v5e/v6e/v7x; tiles use ~few MiB
        ),
    )(logits, target2d)     # NOTE: no dtype cast here — cast happens in-kernel

    if reduction == "none":
        return out[:B, 0]
    return out[0, 0]


def _reference(logits, target, reduction="mean"):
    # Pure-JAX reference mirroring the PyTorch module literally.
    logits = logits.astype(jnp.float32)
    exps = jnp.exp(logits)
    logs = jnp.log(1.0 + exps)
    neg = jnp.concatenate(
        [
            logs[:, :1] - logits[:, :1],
            logs[:, 1:] + logs[:, :-1] - jnp.log(exps[:, 1:] - exps[:, :-1]),
            logs[:, -1:],
        ],
        axis=1,
    )
    loss = jnp.take_along_axis(neg, target[:, None], axis=1)[:, 0]
    if reduction == "mean":
        return loss.mean()
    if reduction == "sum":
        return loss.sum()
    return loss


def _make_inputs(key, B, K):
    k1, k2 = jax.random.split(key)
    # Strictly increasing logits per row (gaps >= 0.1) — the regime the
    # cumulative-link loss requires (exp(x_t) - exp(x_{t-1}) > 0).
    steps = 0.1 + jnp.abs(jax.random.normal(k1, (B, K), dtype=jnp.float32))
    logits = jnp.cumsum(steps, axis=1) - 2.0
    target = jax.random.randint(k2, (B,), 0, K + 1, dtype=jnp.int32)  # in [0, K]
    return logits, target


def _check(B, K, block_rows=None, key=None):
    logits, target = _make_inputs(key, B, K)
    for red in ("mean", "sum", "none"):
        out = cl_with_logits_loss(logits, target, reduction=red, block_rows=block_rows)
        jax.block_until_ready(out)
        ref = _reference(logits, target, red)
        assert out.shape == ref.shape, (red, out.shape, ref.shape)
        assert jnp.allclose(out, ref, rtol=1e-5, atol=1e-5), (red, out, ref)


if __name__ == "__main__":
    key = jax.random.PRNGKey(0)
    k0, k1, k2 = jax.random.split(key, 3)

    # Main demo: B=8, L=9 -> logits (8, 8), target (8,)
    _check(B=8, K=8, key=k0)
    # Multi-tile path (3 tiles of 16 rows) exercising the resident accumulator.
    _check(B=48, K=8, block_rows=16, key=k1)
    # Padded path (B=20 padded to 32, 2 tiles) exercising the valid-row mask.
    _check(B=20, K=8, block_rows=16, key=k2)

    print("KERNEL_OK")
</pallas_src>

<mosaic_0001>
module attributes {stable_mosaic.version = 11 : i64} {
  func.func @_cl_loss_kernel(%arg0: i32, %arg1: memref<8x8xf32, #tpu.memory_space<vmem>>, %arg2: memref<8x1xi32, #tpu.memory_space<vmem>>, %arg3: memref<1x1xf32, #tpu.memory_space<vmem>>) attributes {dimension_semantics = [#tpu.dimension_semantics<arbitrary>], iteration_bounds = array<i64: 1>, scalar_prefetch = 0 : i64, scratch_operands = 0 : i64, tpu.core_type = #tpu.core_type<tc>, window_params = [{transform_indices = @transform_0, window_bounds = array<i64: 8, 8>}, {transform_indices = @transform_1, window_bounds = array<i64: 8, 1>}, {pipeline_mode = #tpu.pipeline_mode<synchronous>, transform_indices = @transform_2, window_bounds = array<i64: 1, 1>}]} {
    %c0 = arith.constant 0 : index
    %c0_0 = arith.constant 0 : index
    %0 = vector.load %arg1[%c0, %c0_0] : memref<8x8xf32, #tpu.memory_space<vmem>>, vector<8x8xf32>
    %c0_1 = arith.constant 0 : index
    %c0_2 = arith.constant 0 : index
    %1 = vector.load %arg2[%c0_1, %c0_2] : memref<8x1xi32, #tpu.memory_space<vmem>>, vector<8x1xi32>
    %2 = tpu.iota {dimensions = array<i32: 1>} : vector<8x8xi32>
    %3 = vector.broadcast %1 : vector<8x1xi32> to vector<8x8xi32>
    %4 = arith.cmpi eq, %2, %3 : vector<8x8xi32>
    %cst = arith.constant 0.000000e+00 : f32
    %5 = vector.broadcast %cst : f32 to vector<8x8xf32>
    %6 = arith.select %4, %0, %5 : vector<8x8xi1>, vector<8x8xf32>
    %cst_3 = arith.constant dense<0.000000e+00> : vector<8xf32>
    %7 = vector.multi_reduction <add>, %6, %cst_3 [1] : vector<8x8xf32> to vector<8xf32>
    %8 = vector.shape_cast %7 : vector<8xf32> to vector<8x1xf32>
    %c1_i32 = arith.constant 1 : i32
    %9 = vector.broadcast %c1_i32 : i32 to vector<8x1xi32>
    %10 = arith.subi %1, %9 : vector<8x1xi32>
    %11 = vector.broadcast %10 : vector<8x1xi32> to vector<8x8xi32>
    %12 = arith.cmpi eq, %2, %11 : vector<8x8xi32>
    %cst_4 = arith.constant 0.000000e+00 : f32
    %13 = vector.broadcast %cst_4 : f32 to vector<8x8xf32>
    %14 = arith.select %12, %0, %13 : vector<8x8xi1>, vector<8x8xf32>
    %cst_5 = arith.constant dense<0.000000e+00> : vector<8xf32>
    %15 = vector.multi_reduction <add>, %14, %cst_5 [1] : vector<8x8xf32> to vector<8xf32>
    %16 = vector.shape_cast %15 : vector<8xf32> to vector<8x1xf32>
    %cst_6 = arith.constant 0.000000e+00 : f32
    %17 = vector.broadcast %cst_6 : f32 to vector<8x1xf32>
    %18 = arith.subf %17, %8 : vector<8x1xf32>
    %cst_7 = arith.constant 0.000000e+00 : f32
    %19 = vector.broadcast %cst_7 : f32 to vector<8x1xf32>
    %20 = arith.maximumf %18, %19 : vector<8x1xf32>
    %21 = math.absf %18 : vector<8x1xf32>
    %cst_8 = arith.constant 0.000000e+00 : f32
    %22 = vector.broadcast %cst_8 : f32 to vector<8x1xf32>
    %23 = arith.subf %22, %21 : vector<8x1xf32>
    %24 = math.exp %23 : vector<8x1xf32>
    %cst_9 = arith.constant 1.000000e+00 : f32
    %25 = vector.broadcast %cst_9 : f32 to vector<8x1xf32>
    %26 = arith.addf %25, %24 : vector<8x1xf32>
    %27 = math.log %26 : vector<8x1xf32>
    %28 = arith.addf %20, %27 : vector<8x1xf32>
    %cst_10 = arith.constant 0.000000e+00 : f32
    %29 = vector.broadcast %cst_10 : f32 to vector<8x1xf32>
    %30 = arith.maximumf %16, %29 : vector<8x1xf32>
    %31 = math.absf %16 : vector<8x1xf32>
    %cst_11 = arith.constant 0.000000e+00 : f32
    %32 = vector.broadcast %cst_11 : f32 to vector<8x1xf32>
    %33 = arith.subf %32, %31 : vector<8x1xf32>
    %34 = math.exp %33 : vector<8x1xf32>
    %cst_12 = arith.constant 1.000000e+00 : f32
    %35 = vector.broadcast %cst_12 : f32 to vector<8x1xf32>
    %36 = arith.addf %35, %34 : vector<8x1xf32>
    %37 = math.log %36 : vector<8x1xf32>
    %38 = arith.addf %30, %37 : vector<8x1xf32>
    %39 = arith.addf %28, %38 : vector<8x1xf32>
    %40 = arith.subf %16, %8 : vector<8x1xf32>
    %41 = math.exp %40 : vector<8x1xf32>
    %cst_13 = arith.constant 1.000000e+00 : f32
    %42 = vector.broadcast %cst_13 : f32 to vector<8x1xf32>
    %43 = arith.subf %42, %41 : vector<8x1xf32>
    %44 = math.log %43 : vector<8x1xf32>
    %45 = arith.subf %39, %44 : vector<8x1xf32>
    %c0_i32 = arith.constant 0 : i32
    %46 = vector.broadcast %c0_i32 : i32 to vector<8x1xi32>
    %47 = arith.cmpi eq, %1, %46 : vector<8x1xi32>
    %c8_i32 = arith.constant 8 : i32
    %48 = vector.broadcast %c8_i32 : i32 to vector<8x1xi32>
    %49 = arith.cmpi eq, %1, %48 : vector<8x1xi32>
    %50 = arith.select %49, %38, %45 : vector<8x1xi1>, vector<8x1xf32>
    %51 = arith.select %47, %28, %50 : vector<8x1xi1>, vector<8x1xf32>
    %c8_i32_14 = arith.constant 8 : i32
    %52 = arith.muli %arg0, %c8_i32_14 : i32
    %53 = tpu.iota {dimensions = array<i32: 0>} : vector<8x1xi32>
    %54 = vector.broadcast %52 : i32 to vector<8x1xi32>
    %55 = arith.addi %54, %53 : vector<8x1xi32>
    %c8_i32_15 = arith.constant 8 : i32
    %56 = vector.broadcast %c8_i32_15 : i32 to vector<8x1xi32>
    %57 = arith.cmpi slt, %55, %56 : vector<8x1xi32>
    %cst_16 = arith.constant 0.000000e+00 : f32
    %58 = vector.broadcast %cst_16 : f32 to vector<8x1xf32>
    %59 = arith.select %57, %51, %58 : vector<8x1xi1>, vector<8x1xf32>
    %60 = vector.shape_cast %59 : vector<8x1xf32> to vector<1x8x1xf32>
    %cst_17 = arith.constant dense<0.000000e+00> : vector<1xf32>
    %61 = vector.multi_reduction <add>, %60, %cst_17 [1, 2] : vector<1x8x1xf32> to vector<1xf32>
    %62 = vector.shape_cast %61 : vector<1xf32> to vector<1x1x1xf32>
    %63 = vector.extract %62[0, 0, 0] : f32 from vector<1x1x1xf32>
    %c0_i32_18 = arith.constant 0 : i32
    %64 = arith.cmpi eq, %arg0, %c0_i32_18 : i32
    %65 = arith.extui %64 : i1 to i32
    %c0_i32_19 = arith.constant 0 : i32
    %66 = arith.cmpi ne, %65, %c0_i32_19 : i32
    scf.if %66 {
      %cst_26 = arith.constant 0.000000e+00 : f32
      %74 = vector.broadcast %cst_26 : f32 to vector<1x1xf32>
      %c0_27 = arith.constant 0 : index
      %c0_28 = arith.constant 0 : index
      %75 = vector.load %arg3[%c0_27, %c0_28] : memref<1x1xf32, #tpu.memory_space<vmem>>, vector<1x1xf32>
      tpu.vector_store %arg3[%c0_27, %c0_28], %74 {strides = array<i32>} : memref<1x1xf32, #tpu.memory_space<vmem>>, vector<1x1xf32>,
    } else {
    }
    %c0_20 = arith.constant 0 : index
    %c0_21 = arith.constant 0 : index
    %67 = vector.load %arg3[%c0_20, %c0_21] : memref<1x1xf32, #tpu.memory_space<vmem>>, vector<1x1xf32>
    %68 = vector.broadcast %63 : f32 to vector<1x1xf32>
    %69 = arith.addf %67, %68 : vector<1x1xf32>
    %c0_22 = arith.constant 0 : index
    %c0_23 = arith.constant 0 : index
    %70 = vector.load %arg3[%c0_22, %c0_23] : memref<1x1xf32, #tpu.memory_space<vmem>>, vector<1x1xf32>
    tpu.vector_store %arg3[%c0_22, %c0_23], %69 {strides = array<i32>} : memref<1x1xf32, #tpu.memory_space<vmem>>, vector<1x1xf32>,
    %c0_i32_24 = arith.constant 0 : i32
    %71 = arith.cmpi eq, %arg0, %c0_i32_24 : i32
    %72 = arith.extui %71 : i1 to i32
    %c0_i32_25 = arith.constant 0 : i32
    %73 = arith.cmpi ne, %72, %c0_i32_25 : i32
    scf.if %73 {
      %c0_26 = arith.constant 0 : index
      %c0_27 = arith.constant 0 : index
      %74 = vector.load %arg3[%c0_26, %c0_27] : memref<1x1xf32, #tpu.memory_space<vmem>>, vector<1x1xf32>
      %cst_28 = arith.constant 8.000000e+00 : f32
      %75 = vector.broadcast %cst_28 : f32 to vector<1x1xf32>
      %76 = arith.divf %74, %75 : vector<1x1xf32>
      %c0_29 = arith.constant 0 : index
      %c0_30 = arith.constant 0 : index
      %77 = vector.load %arg3[%c0_29, %c0_30] : memref<1x1xf32, #tpu.memory_space<vmem>>, vector<1x1xf32>
      tpu.vector_store %arg3[%c0_29, %c0_30], %76 {strides = array<i32>} : memref<1x1xf32, #tpu.memory_space<vmem>>, vector<1x1xf32>,
    } else {
    }
    return
  }
  func.func @transform_0(%arg0: i32) -> (i32, i32) {
    %c0_i32 = arith.constant 0 : i32
    %c0_i32_0 = arith.constant 0 : i32
    return %arg0, %c0_i32 : i32, i32
  }
  func.func @transform_1(%arg0: i32) -> (i32, i32) {
    %c0_i32 = arith.constant 0 : i32
    %c0_i32_0 = arith.constant 0 : i32
    return %arg0, %c0_i32 : i32, i32
  }
  func.func @transform_2(%arg0: i32) -> (i32, i32) {
    %c0_i32 = arith.constant 0 : i32
    %c0_i32_0 = arith.constant 0 : i32
    %c0_i32_1 = arith.constant 0 : i32
    return %c0_i32, %c0_i32_0 : i32, i32
  }
}

</mosaic_0001>

<bundles_post_ra>
// kernel: tpu_custom_call.1
= control target key start
LH: loop header
LB: loop body
LE: loop exit
PB: predicated region body
PF: predicated region fallthrough
CT: control target
= control target key end

     0   :  { %s186_s0 = inlined_call_operand.vmem [shape: f32[8,8], index: 0, kind: input, shape index: {}]   ;;  %s187_s1 = inlined_call_operand.vmem [shape: s32[8,1], index: 1, kind: input, shape index: {}]   ;;  %s188_s2 = inlined_call_operand.hbm [shape: f32[1,1], index: 2, kind: output, shape index: {}]  }
   0x1   :  { %v13_v0 = vld [vmem:[%s187_s1] sm:$0xff] }
   0x2   :  { %7 = vsyncpa [#allocation3], 0  ;;  %v156_v1 = vmov 0   ;;  %v115_v2 = vadd.s32 4294967295, %v13_v0  ;;  %v14_v3 = vlaneseq  ;;  %v12_v5 = vld [vmem:[%s186_s0] sm:$0xff]  ;;  %vm21_vm0 = vcmask 64512  }
   0x3   :  { %121 = vset.pattern.permute.xlu0 %v156_v1  ;;  %vm62_vm3 = vcmp.eq.s32.totalorder %v13_v0, 8  ;;  %vm61_vm4 = vcmp.eq.s32.totalorder %v13_v0, 0  ;;  %vm72_vm5 = vcmask 7168   ;;  %vm87_vm6 = vcmask 0   ;;  %s158_s1 = smov [#allocation2]  }
   0x4   :  { %17 = vperm.xlu0 %121, %v13_v0   ;;  %v15_v4 = vand.u32 127, %v14_v3  ;;  %v157_v44 = vmov 0.0   ;;  %s107_s13 = sshll.u32 %s158_s1, 4  ;;  %s108_s13 = int_to_ptr.vmem [resolvable:$true] %s107_s13 }
   0x5   :  { %88 = vst.msk [vmem:[#allocation2] sm:$0x1] %vm87_vm6, %v157_v44  ;;  %s134_s14 = scalar_lea.vmem %s108_s13, 16  ;;  %s138_s15 = scalar_lea.vmem %s108_s13, 32 }
   0x6   :  { %p135_p0 = scmp.ne.s32.totalorder %s108_s13, %s134_s14  ;;  %p139_p1 = scmp.lt.s32.totalorder %s108_s13, %s108_s13 }
   0x7   :  { %p140_p2 = scmp.lt.s32.totalorder %s138_s15, %s134_s14 }
   0x8   :  { %27 = vperm.xlu0 %121, %v115_v2  }
   0x9   :  { %p141_p3 = por %p140_p2, %p139_p1 }
   0xb   :  { %p142_p4 = pnand %p141_p3, %p135_p0 }
   0xc   :  { %v89_v52 = vld [vmem:[#allocation2] sm:$0x1] }
  0x7f   :  { %v18_v6 = vpop.permute.xlu0 %17 }
  0x80   :  { %vm19_vm1 = vcmp.eq.s32.totalorder %v15_v4, %v18_v6 }
  0x81   :  { %v20_v7 = vsel %vm19_vm1, %v12_v5, 0.0 }
  0x82   :  { %v22_v8 = vsel %vm21_vm0, %v20_v7, 0.0 }
  0x83   :  { %v28_v9 = vpop.permute.xlu0 %27  ;;  %23 = vadd.xlane.f32.xlu1 %v22_v8 }
  0x84   :  { %vm29_vm2 = vcmp.eq.s32.totalorder %v15_v4, %v28_v9 }
  0x85   :  { %v30_v10 = vsel %vm29_vm2, %v12_v5, 0.0 }
  0x86   :  { %v31_v11 = vsel %vm21_vm0, %v30_v10, 0.0 }
  0x87   :  { %32 = vadd.xlane.f32.xlu1 %v31_v11 }
 0x10c   :  { %v24_v12 = vpop.xlane.xlu1 %23 }
 0x10d   :  { %v34_v13 = vsub.f32 0.0, %v24_v12 }
 0x10f   :  { %v36_v14 = vand.u32 2147483647, %v34_v13  ;;  %v35_v32 = vmax.f32 %v34_v13, 0.0 }
 0x110   :  { %v33_v15 = vpop.xlane.xlu1 %32 }
 0x111   :  { %v37_v16 = vsub.f32 0.0, %v36_v14  ;;  %v45_v17 = vand.u32 2147483647, %v33_v15  ;;  %v54_v18 = vsub.f32 %v33_v15, %v24_v12  ;;  %v44_v33 = vmax.f32 %v33_v15, 0.0 }
 0x113   :  { %v38_v19 = vmul.f32 1.442695, %v37_v16  ;;  %v46_v20 = vsub.f32 0.0, %v45_v17  ;;  %v55_v21 = vmul.f32 1.442695, %v54_v18 }
 0x115   :  { %122 = vpow2.f32 %v38_v19  ;;  %v47_v22 = vmul.f32 1.442695, %v46_v20 }
 0x116   :  { %124 = vpow2.f32 %v55_v21 }
 0x117   :  { %126 = vpow2.f32 %v47_v22 }
 0x122   :  { %v123_v23 = vpop.eup %122 }
 0x123   :  { %v125_v24 = vpop.eup %124  ;;  %v40_v25 = vadd.f32 1.0, %v123_v23 }
 0x124   :  { %v127_v26 = vpop.eup %126  ;;  %v57_v28 = vsub.f32 1.0, %v125_v24 }
 0x125   :  { %128 = vlog2.f32 %v40_v25  ;;  %v49_v27 = vadd.f32 1.0, %v127_v26 }
 0x127   :  { %130 = vlog2.f32 %v49_v27 }
 0x128   :  { %132 = vlog2.f32 %v57_v28 }
 0x132   :  { %v129_v29 = vpop.eup %128 }
 0x133   :  { %v42_v30 = vmul.f32 0.6931472, %v129_v29 }
 0x134   :  { %v131_v31 = vpop.eup %130 }
 0x135   :  { %v51_v34 = vmul.f32 0.6931472, %v131_v31  ;;  %v133_v35 = vpop.eup %132  ;;  %v43_v36 = vadd.f32 %v42_v30, %v35_v32 }
 0x136   :  { %v59_v39 = vmul.f32 0.6931472, %v133_v35 }
 0x137   :  { %v52_v37 = vadd.f32 %v51_v34, %v44_v33 }
 0x139   :  { %v53_v38 = vadd.f32 %v52_v37, %v43_v36 }
 0x13b   :  { %v60_v40 = vsub.f32 %v53_v38, %v59_v39 }
 0x13d   :  { %v63_v41 = vsel %vm62_vm3, %v52_v37, %v60_v40 }
 0x13e   :  { %v64_v42 = vsel %vm61_vm4, %v43_v36, %v63_v41 }
 0x13f   :  { %v73_v43 = vsel %vm72_vm5, %v64_v42, 0.0 }
 0x140   :  { %74 = vadd.xlane.f32.xlu0 %v73_v43 }
 0x1c9   :  { %v75_v45 = vpop.xlane.xlu0 %74 }
 0x1ca   :  { %v76_v46 = vrot.slane %v75_v45, 4 }
 0x1cc   :  { %v77_v47 = vadd.f32 %v76_v46, %v75_v45 }
 0x1ce   :  { %v78_v48 = vrot.slane %v77_v47, 2 }
 0x1d0   :  { %v79_v49 = vadd.f32 %v78_v48, %v77_v47 }
 0x1d2   :  { %v80_v50 = vrot.slane %v79_v49, 1 }
 0x1d4   :  { %v81_v51 = vadd.f32 %v80_v50, %v79_v49 }
 0x1d6   :  { %116 = vpush %v81_v51 }
 0x207   :  { %s117_s0 = spop %116 }
 0x208   :  { %v90_v53 = vstv %s117_s0 }
 0x209   :  { %v91_v54 = vadd.f32 %v90_v53, %v89_v52 }
 0x20b   :  { %93 = vst.msk [vmem:[#allocation2] sm:$0x1] %vm87_vm6, %v91_v54 }
 0x212   :  { %v97_v55 = vld [vmem:[#allocation2] sm:$0x1] }
 0x213   :  { %v99_v56 = vmul.f32 0.125, %v97_v55 }
 0x215   :  { %100 = vst.msk [vmem:[#allocation2] sm:$0x1] %vm87_vm6, %v99_v56 }
 0x216   :  { %145 = shalt.err (!%p142_p4)
}
 0x217   :  { %110 = dma.vmem_to_hbm [thread:$0]  %s108_s13, 16, %s188_s2, [#allocation3]  }
 0x218   :  { %154 = dma.done.wait [#allocation3], 16  }
 0x219   :  { %155 = vsyncadd [#allocation3], 4294967280 }
 0x21a   :  { %114 = vsyncpa [#allocation3], 1 }

</bundles_post_ra>
